<compile_context>
chip_gen: v7x
topology: tpu7x:2x2x1
jax: 0.10.0
libtpu: 0.0.40
codegen_flags: <defaults>
</compile_context>

<pallas_src>
import jax
import jax.numpy as jnp
from jax.experimental import pallas as pl
from jax.experimental.pallas import tpu as pltpu


def _printability_kernel(rgb_ref, patch_ref, out_ref):
    # rgb_ref   : SMEM (N*3,) f32   flat color table, rgb[n, c] lives at n*3 + c
    # patch_ref : VMEM (3, TB, S)   channel-major patch block, S = P*P lanes
    # out_ref   : VMEM (TB, 1) f32  per-patch printability scores for the block
    n_colors = rgb_ref.shape[0] // 3
    acc = None
    for c in range(3):                               # static unroll: channels
        x = patch_ref[c].astype(jnp.float32)         # (TB, S) lane-dense plane
        m = None
        for n in range(n_colors):                    # static unroll: colors
            d = jnp.abs(x - rgb_ref[n * 3 + c])      # scalar SMEM read + splat
            m = d if m is None else jnp.minimum(m, d)
        acc = m if acc is None else acc + m
    # One batched cross-lane reduction per grid step (not per patch).
    out_ref[...] = jnp.sum(acc, axis=1, keepdims=True)


def printability_scores(patches, rgb, *, patch_dtype=jnp.float32,
                        block_patches=None):
    """patches: (B, 3, P, P), rgb: (N, 3) -> (B,) f32 scores (one per patch)."""
    bsz, ch, ph, pw = patches.shape
    assert ch == 3, "expected RGB patches"
    s = ph * pw

    # Channel-major, lane-dense layout: (3, B, P*P).  Wrapper-side layout
    # plumbing; the kernel then only touches dense (TB, S) planes.
    x = jnp.transpose(patches.astype(patch_dtype).reshape(bsz, ch, s),
                      (1, 0, 2))

    # --- choose patch-block size TB (multiple of 8, VMEM-budget bound) ---
    if block_patches is None:
        itemsize = jnp.dtype(patch_dtype).itemsize
        budget = 8 * 1024 * 1024                      # double-buffered target
        tb = budget // (2 * 3 * s * itemsize)
        tb = max(8, min(512, (tb // 8) * 8))
    else:
        tb = int(block_patches)
        assert tb % 8 == 0, "block_patches must be a multiple of 8"
    tb = min(tb, ((bsz + 7) // 8) * 8)                # no bigger than needed

    b_pad = ((bsz + tb - 1) // tb) * tb
    if b_pad != bsz:
        # padded rows compute garbage scores (per-row independent); sliced off.
        x = jnp.pad(x, ((0, 0), (0, b_pad - bsz), (0, 0)))

    rgb_flat = rgb.astype(jnp.float32).reshape(-1)    # (N*3,) -> SMEM (1-D, no pad blowup)

    out = pl.pallas_call(
        _printability_kernel,
        out_shape=jax.ShapeDtypeStruct((b_pad, 1), jnp.float32),
        grid=(b_pad // tb,),
        in_specs=[
            pl.BlockSpec(memory_space=pltpu.MemorySpace.SMEM),   # rgb table
            pl.BlockSpec((3, tb, s), lambda i: (0, i, 0)),       # patch block
        ],
        out_specs=pl.BlockSpec((tb, 1), lambda i: (i, 0)),
        compiler_params=pltpu.CompilerParams(
            dimension_semantics=("parallel",),        # shard batch over TCs (v7x)
            vmem_limit_bytes=32 * 1024 * 1024,        # explicit, leaves headroom on v7x
        ),
    )(rgb_flat, x)
    return out[:bsz, 0]


def printability_score(patch, rgb):
    """Module-equivalent forward: patch (1, 3, P, P), rgb (N, 3) -> scalar."""
    return printability_scores(patch, rgb)[0]


def make_colors(rgb, patch_dim):
    """Mirror of the PyTorch __init__ broadcast: colors[n, c, h, w] = rgb[n, c]."""
    ones = jnp.ones((patch_dim, patch_dim), dtype=jnp.float32)
    return rgb[:, :, None, None] * ones[None, None, :, :]


if __name__ == "__main__":
    PATCH_DIM = 16
    N_COLORS = 8
    BATCH = 4

    key = jax.random.PRNGKey(0)
    k_rgb, k_patch, k_batch = jax.random.split(key, 3)

    # TODO(synk): the original __init__ reads a printable-colors JSON file and
    # subsamples it host-side; replaced here by a deterministic random table.
    rgb = jax.random.uniform(k_rgb, (N_COLORS, 3), dtype=jnp.float32)
    colors = make_colors(rgb, PATCH_DIM)                                 # (N, 3, P, P)

    # --- module-exact call: single (1, 3, P, P) patch -> scalar score ---
    patch = jax.random.uniform(k_patch, (1, 3, PATCH_DIM, PATCH_DIM),
                               dtype=jnp.float32)
    score = jax.block_until_ready(printability_score(patch, rgb))

    delta_ref = jnp.squeeze(patch[None] - colors[:, None])               # (N, 3, P, P)
    ref = jnp.sum(jnp.min(jnp.abs(delta_ref), axis=0))
    assert jnp.allclose(score, ref, rtol=1e-5, atol=1e-5), (score, ref)

    # --- batched call: many patches amortized over one pipelined pallas_call ---
    patches = jax.random.uniform(k_batch, (BATCH, 3, PATCH_DIM, PATCH_DIM),
                                 dtype=jnp.float32)
    scores = jax.block_until_ready(printability_scores(patches, rgb))
    refs = jnp.stack([jnp.sum(jnp.min(jnp.abs(patches[i][None] - colors), axis=0))
                      for i in range(BATCH)])
    assert jnp.allclose(scores, refs, rtol=1e-5, atol=1e-5), (scores, refs)

    # --- bf16 patch traffic (halves HBM bytes); f32 accumulation inside ---
    scores_bf16 = jax.block_until_ready(
        printability_scores(patches, rgb, patch_dtype=jnp.bfloat16))
    assert jnp.allclose(scores_bf16, refs, rtol=5e-2, atol=2.0), (scores_bf16, refs)

    print("KERNEL_OK")
</pallas_src>

<mosaic_0001>
module attributes {stable_mosaic.version = 11 : i64} {
  func.func @_printability_kernel(%arg0: i32, %arg1: memref<24xf32, #tpu.memory_space<smem>>, %arg2: memref<3x8x256xf32, #tpu.memory_space<vmem>>, %arg3: memref<8x1xf32, #tpu.memory_space<vmem>>) attributes {dimension_semantics = [#tpu.dimension_semantics<parallel>], iteration_bounds = array<i64: 1>, scalar_prefetch = 0 : i64, scratch_operands = 0 : i64, tpu.core_type = #tpu.core_type<tc>, window_params = [{transform_indices = @transform_0, window_bounds = array<i64: 24>}, {transform_indices = @transform_1, window_bounds = array<i64: 3, 8, 256>}, {transform_indices = @transform_2, window_bounds = array<i64: 8, 1>}]} {
    %c0 = arith.constant 0 : index
    %c0_0 = arith.constant 0 : index
    %c0_1 = arith.constant 0 : index
    %0 = vector.load %arg2[%c0, %c0_0, %c0_1] : memref<3x8x256xf32, #tpu.memory_space<vmem>>, vector<1x8x256xf32>
    %1 = vector.shape_cast %0 : vector<1x8x256xf32> to vector<8x256xf32>
    %c0_2 = arith.constant 0 : index
    %2 = memref.load %arg1[%c0_2] : memref<24xf32, #tpu.memory_space<smem>>
    %3 = vector.broadcast %2 : f32 to vector<8x256xf32>
    %4 = arith.subf %1, %3 : vector<8x256xf32>
    %5 = math.absf %4 : vector<8x256xf32>
    %c3 = arith.constant 3 : index
    %6 = memref.load %arg1[%c3] : memref<24xf32, #tpu.memory_space<smem>>
    %7 = vector.broadcast %6 : f32 to vector<8x256xf32>
    %8 = arith.subf %1, %7 : vector<8x256xf32>
    %9 = math.absf %8 : vector<8x256xf32>
    %10 = arith.minimumf %5, %9 : vector<8x256xf32>
    %c6 = arith.constant 6 : index
    %11 = memref.load %arg1[%c6] : memref<24xf32, #tpu.memory_space<smem>>
    %12 = vector.broadcast %11 : f32 to vector<8x256xf32>
    %13 = arith.subf %1, %12 : vector<8x256xf32>
    %14 = math.absf %13 : vector<8x256xf32>
    %15 = arith.minimumf %10, %14 : vector<8x256xf32>
    %c9 = arith.constant 9 : index
    %16 = memref.load %arg1[%c9] : memref<24xf32, #tpu.memory_space<smem>>
    %17 = vector.broadcast %16 : f32 to vector<8x256xf32>
    %18 = arith.subf %1, %17 : vector<8x256xf32>
    %19 = math.absf %18 : vector<8x256xf32>
    %20 = arith.minimumf %15, %19 : vector<8x256xf32>
    %c12 = arith.constant 12 : index
    %21 = memref.load %arg1[%c12] : memref<24xf32, #tpu.memory_space<smem>>
    %22 = vector.broadcast %21 : f32 to vector<8x256xf32>
    %23 = arith.subf %1, %22 : vector<8x256xf32>
    %24 = math.absf %23 : vector<8x256xf32>
    %25 = arith.minimumf %20, %24 : vector<8x256xf32>
    %c15 = arith.constant 15 : index
    %26 = memref.load %arg1[%c15] : memref<24xf32, #tpu.memory_space<smem>>
    %27 = vector.broadcast %26 : f32 to vector<8x256xf32>
    %28 = arith.subf %1, %27 : vector<8x256xf32>
    %29 = math.absf %28 : vector<8x256xf32>
    %30 = arith.minimumf %25, %29 : vector<8x256xf32>
    %c18 = arith.constant 18 : index
    %31 = memref.load %arg1[%c18] : memref<24xf32, #tpu.memory_space<smem>>
    %32 = vector.broadcast %31 : f32 to vector<8x256xf32>
    %33 = arith.subf %1, %32 : vector<8x256xf32>
    %34 = math.absf %33 : vector<8x256xf32>
    %35 = arith.minimumf %30, %34 : vector<8x256xf32>
    %c21 = arith.constant 21 : index
    %36 = memref.load %arg1[%c21] : memref<24xf32, #tpu.memory_space<smem>>
    %37 = vector.broadcast %36 : f32 to vector<8x256xf32>
    %38 = arith.subf %1, %37 : vector<8x256xf32>
    %39 = math.absf %38 : vector<8x256xf32>
    %40 = arith.minimumf %35, %39 : vector<8x256xf32>
    %c1 = arith.constant 1 : index
    %c0_3 = arith.constant 0 : index
    %c0_4 = arith.constant 0 : index
    %41 = vector.load %arg2[%c1, %c0_3, %c0_4] : memref<3x8x256xf32, #tpu.memory_space<vmem>>, vector<1x8x256xf32>
    %42 = vector.shape_cast %41 : vector<1x8x256xf32> to vector<8x256xf32>
    %c1_5 = arith.constant 1 : index
    %43 = memref.load %arg1[%c1_5] : memref<24xf32, #tpu.memory_space<smem>>
    %44 = vector.broadcast %43 : f32 to vector<8x256xf32>
    %45 = arith.subf %42, %44 : vector<8x256xf32>
    %46 = math.absf %45 : vector<8x256xf32>
    %c4 = arith.constant 4 : index
    %47 = memref.load %arg1[%c4] : memref<24xf32, #tpu.memory_space<smem>>
    %48 = vector.broadcast %47 : f32 to vector<8x256xf32>
    %49 = arith.subf %42, %48 : vector<8x256xf32>
    %50 = math.absf %49 : vector<8x256xf32>
    %51 = arith.minimumf %46, %50 : vector<8x256xf32>
    %c7 = arith.constant 7 : index
    %52 = memref.load %arg1[%c7] : memref<24xf32, #tpu.memory_space<smem>>
    %53 = vector.broadcast %52 : f32 to vector<8x256xf32>
    %54 = arith.subf %42, %53 : vector<8x256xf32>
    %55 = math.absf %54 : vector<8x256xf32>
    %56 = arith.minimumf %51, %55 : vector<8x256xf32>
    %c10 = arith.constant 10 : index
    %57 = memref.load %arg1[%c10] : memref<24xf32, #tpu.memory_space<smem>>
    %58 = vector.broadcast %57 : f32 to vector<8x256xf32>
    %59 = arith.subf %42, %58 : vector<8x256xf32>
    %60 = math.absf %59 : vector<8x256xf32>
    %61 = arith.minimumf %56, %60 : vector<8x256xf32>
    %c13 = arith.constant 13 : index
    %62 = memref.load %arg1[%c13] : memref<24xf32, #tpu.memory_space<smem>>
    %63 = vector.broadcast %62 : f32 to vector<8x256xf32>
    %64 = arith.subf %42, %63 : vector<8x256xf32>
    %65 = math.absf %64 : vector<8x256xf32>
    %66 = arith.minimumf %61, %65 : vector<8x256xf32>
    %c16 = arith.constant 16 : index
    %67 = memref.load %arg1[%c16] : memref<24xf32, #tpu.memory_space<smem>>
    %68 = vector.broadcast %67 : f32 to vector<8x256xf32>
    %69 = arith.subf %42, %68 : vector<8x256xf32>
    %70 = math.absf %69 : vector<8x256xf32>
    %71 = arith.minimumf %66, %70 : vector<8x256xf32>
    %c19 = arith.constant 19 : index
    %72 = memref.load %arg1[%c19] : memref<24xf32, #tpu.memory_space<smem>>
    %73 = vector.broadcast %72 : f32 to vector<8x256xf32>
    %74 = arith.subf %42, %73 : vector<8x256xf32>
    %75 = math.absf %74 : vector<8x256xf32>
    %76 = arith.minimumf %71, %75 : vector<8x256xf32>
    %c22 = arith.constant 22 : index
    %77 = memref.load %arg1[%c22] : memref<24xf32, #tpu.memory_space<smem>>
    %78 = vector.broadcast %77 : f32 to vector<8x256xf32>
    %79 = arith.subf %42, %78 : vector<8x256xf32>
    %80 = math.absf %79 : vector<8x256xf32>
    %81 = arith.minimumf %76, %80 : vector<8x256xf32>
    %82 = arith.addf %40, %81 : vector<8x256xf32>
    %c2 = arith.constant 2 : index
    %c0_6 = arith.constant 0 : index
    %c0_7 = arith.constant 0 : index
    %83 = vector.load %arg2[%c2, %c0_6, %c0_7] : memref<3x8x256xf32, #tpu.memory_space<vmem>>, vector<1x8x256xf32>
    %84 = vector.shape_cast %83 : vector<1x8x256xf32> to vector<8x256xf32>
    %c2_8 = arith.constant 2 : index
    %85 = memref.load %arg1[%c2_8] : memref<24xf32, #tpu.memory_space<smem>>
    %86 = vector.broadcast %85 : f32 to vector<8x256xf32>
    %87 = arith.subf %84, %86 : vector<8x256xf32>
    %88 = math.absf %87 : vector<8x256xf32>
    %c5 = arith.constant 5 : index
    %89 = memref.load %arg1[%c5] : memref<24xf32, #tpu.memory_space<smem>>
    %90 = vector.broadcast %89 : f32 to vector<8x256xf32>
    %91 = arith.subf %84, %90 : vector<8x256xf32>
    %92 = math.absf %91 : vector<8x256xf32>
    %93 = arith.minimumf %88, %92 : vector<8x256xf32>
    %c8 = arith.constant 8 : index
    %94 = memref.load %arg1[%c8] : memref<24xf32, #tpu.memory_space<smem>>
    %95 = vector.broadcast %94 : f32 to vector<8x256xf32>
    %96 = arith.subf %84, %95 : vector<8x256xf32>
    %97 = math.absf %96 : vector<8x256xf32>
    %98 = arith.minimumf %93, %97 : vector<8x256xf32>
    %c11 = arith.constant 11 : index
    %99 = memref.load %arg1[%c11] : memref<24xf32, #tpu.memory_space<smem>>
    %100 = vector.broadcast %99 : f32 to vector<8x256xf32>
    %101 = arith.subf %84, %100 : vector<8x256xf32>
    %102 = math.absf %101 : vector<8x256xf32>
    %103 = arith.minimumf %98, %102 : vector<8x256xf32>
    %c14 = arith.constant 14 : index
    %104 = memref.load %arg1[%c14] : memref<24xf32, #tpu.memory_space<smem>>
    %105 = vector.broadcast %104 : f32 to vector<8x256xf32>
    %106 = arith.subf %84, %105 : vector<8x256xf32>
    %107 = math.absf %106 : vector<8x256xf32>
    %108 = arith.minimumf %103, %107 : vector<8x256xf32>
    %c17 = arith.constant 17 : index
    %109 = memref.load %arg1[%c17] : memref<24xf32, #tpu.memory_space<smem>>
    %110 = vector.broadcast %109 : f32 to vector<8x256xf32>
    %111 = arith.subf %84, %110 : vector<8x256xf32>
    %112 = math.absf %111 : vector<8x256xf32>
    %113 = arith.minimumf %108, %112 : vector<8x256xf32>
    %c20 = arith.constant 20 : index
    %114 = memref.load %arg1[%c20] : memref<24xf32, #tpu.memory_space<smem>>
    %115 = vector.broadcast %114 : f32 to vector<8x256xf32>
    %116 = arith.subf %84, %115 : vector<8x256xf32>
    %117 = math.absf %116 : vector<8x256xf32>
    %118 = arith.minimumf %113, %117 : vector<8x256xf32>
    %c23 = arith.constant 23 : index
    %119 = memref.load %arg1[%c23] : memref<24xf32, #tpu.memory_space<smem>>
    %120 = vector.broadcast %119 : f32 to vector<8x256xf32>
    %121 = arith.subf %84, %120 : vector<8x256xf32>
    %122 = math.absf %121 : vector<8x256xf32>
    %123 = arith.minimumf %118, %122 : vector<8x256xf32>
    %124 = arith.addf %82, %123 : vector<8x256xf32>
    %cst = arith.constant dense<0.000000e+00> : vector<8xf32>
    %125 = vector.multi_reduction <add>, %124, %cst [1] : vector<8x256xf32> to vector<8xf32>
    %126 = vector.shape_cast %125 : vector<8xf32> to vector<8x1xf32>
    %c0_9 = arith.constant 0 : index
    %c0_10 = arith.constant 0 : index
    %127 = vector.load %arg3[%c0_9, %c0_10] : memref<8x1xf32, #tpu.memory_space<vmem>>, vector<8x1xf32>
    tpu.vector_store %arg3[%c0_9, %c0_10], %126 {strides = array<i32>} : memref<8x1xf32, #tpu.memory_space<vmem>>, vector<8x1xf32>,
    return
  }
  func.func @transform_0(%arg0: i32) -> i32 {
    %c0_i32 = arith.constant 0 : i32
    %c0_i32_0 = arith.constant 0 : i32
    return %c0_i32 : i32
  }
  func.func @transform_1(%arg0: i32) -> (i32, i32, i32) {
    %c0_i32 = arith.constant 0 : i32
    %c0_i32_0 = arith.constant 0 : i32
    %c0_i32_1 = arith.constant 0 : i32
    return %c0_i32, %arg0, %c0_i32_0 : i32, i32, i32
  }
  func.func @transform_2(%arg0: i32) -> (i32, i32) {
    %c0_i32 = arith.constant 0 : i32
    %c0_i32_0 = arith.constant 0 : i32
    return %arg0, %c0_i32 : i32, i32
  }
}

</mosaic_0001>

<bundles_post_ra>
// kernel: tpu_custom_call.1
= control target key start
LH: loop header
LB: loop body
LE: loop exit
PB: predicated region body
PF: predicated region fallthrough
CT: control target
= control target key end

     0   :  { %7 = vsyncpa [#allocation4], 0  ;;  %s461_s0 = inlined_call_operand.hbm [shape: f32[24], index: 0, kind: input, shape index: {}]   ;;  %s462_s1 = inlined_call_operand.hbm [shape: f32[3,8,256], index: 1, kind: input, shape index: {}]   ;;  %s463_s2 = inlined_call_operand.vmem [shape: f32[8,1], index: 2, kind: output, shape index: {}]  }
   0x1   :  { %8 = vsyncpa [#allocation3], 0  ;;  %s272_s11 = scalar_lea.hbm %s461_s0, 16 }
   0x2   :  { %p273_p0 = scmp.ne.s32.totalorder %s461_s0, %s272_s11  ;;  %p276_p1 = scmp.lt.u32.totalorder %s272_s11, %s461_s0 }
   0x4   :  { %p278_p2 = pnand %p276_p1, %p273_p0 }
   0x6   :  { %281 = shalt.err (!%p278_p2)
}
   0x7   :  { %s308_s16 = smov [#allocation2]   ;;  %s309_s19 = smov [#allocation5]  }
   0x8   :  { %16 = dma.hbm_to_smem %s461_s0, 16, %s308_s16, [#allocation4]  }
   0x9   :  { %s22_s20 = sshll.u32 %s309_s19, 4  ;;  %s282_s23 = scalar_lea.hbm %s462_s1, 768  ;;  %s23_s20 = int_to_ptr.vmem [resolvable:$true] %s22_s20 }
   0xa   :  { %p283_p3 = scmp.ne.s32.totalorder %s462_s1, %s282_s23  ;;  %p286_p4 = scmp.lt.u32.totalorder %s282_s23, %s462_s1 }
   0xc   :  { %p288_p5 = pnand %p286_p4, %p283_p3 }
   0xe   :  { %291 = shalt.err (!%p288_p5)
}
   0xf   :  { %s292_s28 = scalar_lea.vmem %s23_s20, 768  ;;  %p297_p7 = scmp.lt.s32.totalorder %s23_s20, %s23_s20 }
  0x10   :  { %p293_p6 = scmp.ne.s32.totalorder %s23_s20, %s292_s28  ;;  %p298_p8 = scmp.lt.s32.totalorder %s292_s28, %s292_s28 }
  0x12   :  { %p299_p9 = por %p298_p8, %p297_p7 }
  0x14   :  { %p300_p10 = pnand %p299_p9, %p293_p6 }
  0x16   :  { %303 = shalt.err (!%p300_p10)
}
  0x17   :  { %s310_s0 = smov 256   ;;  %s311_s29 = smov 16  }
  0x18   :  { %28 = dma.hbm_to_vmem [thread:$0]  %s462_s1, 768, %s23_s20, [#allocation3], %s310_s0, %s310_s0, %s311_s29  }
  0x19   :  { %304 = dma.done.wait [#allocation4], 16  }
  0x1a   :  { %305 = vsyncadd [#allocation4], 4294967280 }
  0x1b   :  { %306 = dma.done.wait [#allocation3], 768  }
  0x1c   :  { %307 = vsyncadd [#allocation3], 4294966528 }
  0x1d   :  { %35 = sfence }
  0x1e   :  { %s38_s4 = sld [smem:[#allocation2]]  ;;  %s245_s5 = sld [smem:[#allocation2 + $0x3]]  ;;  %v36_v0 = vld [vmem:[#allocation5] sm:$0xff]  ;;  %v37_v1 = vld [vmem:[#allocation5 + $0x8] sm:$0xff]  ;;  %v368_v40 = vld [vmem:[#allocation5 + $0x10] sm:$0xff]  ;;  %vm237_vm0 = vcmask 7168  }
  0x1f   :  { %s246_s6 = sld [smem:[#allocation2 + $0x6]]  ;;  %s247_s7 = sld [smem:[#allocation2 + $0x9]]  ;;  %v370_v43 = vld [vmem:[#allocation5 + $0x18] sm:$0xff] }
  0x20   :  { %s248_s8 = sld [smem:[#allocation2 + $0xc]]  ;;  %s351_s9 = sld [smem:[#allocation2 + $0xf]] }
  0x21   :  { %s353_s10 = sld [smem:[#allocation2 + $0x12]]  ;;  %s355_s1 = sld [smem:[#allocation2 + $0x15]] }
  0x22   :  { %s358_s11 = sld [smem:[#allocation2 + $0x1]]  ;;  %s360_s12 = sld [smem:[#allocation2 + $0x4]] }
  0x23   :  { %s362_s13 = sld [smem:[#allocation2 + $0x7]]  ;;  %s366_s14 = sld [smem:[#allocation2 + $0xa]] }
  0x24   :  { %v39_v2 = vstv %s38_s4  ;;  %v45_v3 = vstv %s245_s5  ;;  %s372_s15 = sld [smem:[#allocation2 + $0xd]]  ;;  %s379_s16 = sld [smem:[#allocation2 + $0x10]] }
  0x25   :  { %v40_v4 = vsub.f32 %v36_v0, %v39_v2  ;;  %v41_v5 = vsub.f32 %v37_v1, %v39_v2  ;;  %v46_v6 = vsub.f32 %v36_v0, %v45_v3  ;;  %v47_v7 = vsub.f32 %v37_v1, %v45_v3  ;;  %s381_s17 = sld [smem:[#allocation2 + $0x13]]  ;;  %s389_s18 = sld [smem:[#allocation2 + $0x16]] }
  0x26   :  { %v53_v8 = vstv %s246_s6  ;;  %v61_v9 = vstv %s247_s7  ;;  %v69_v10 = vstv %s248_s8  ;;  %v77_v11 = vstv %s351_s9  ;;  %s394_s19 = sld [smem:[#allocation2 + $0x2]]  ;;  %s399_s20 = sld [smem:[#allocation2 + $0x5]] }
  0x27   :  { %v42_v12 = vand.u32 2147483647, %v40_v4  ;;  %v43_v13 = vand.u32 2147483647, %v41_v5  ;;  %v48_v14 = vand.u32 2147483647, %v46_v6  ;;  %v54_v15 = vsub.f32 %v36_v0, %v53_v8 }
  0x28   :  { %v49_v16 = vand.u32 2147483647, %v47_v7  ;;  %v55_v17 = vsub.f32 %v37_v1, %v53_v8  ;;  %v62_v18 = vsub.f32 %v36_v0, %v61_v9  ;;  %v63_v19 = vsub.f32 %v37_v1, %v61_v9  ;;  %s406_s21 = sld [smem:[#allocation2 + $0x8]]  ;;  %s417_s22 = sld [smem:[#allocation2 + $0xb]] }
  0x29   :  { %v50_v20 = vmin.f32 %v42_v12, %v48_v14  ;;  %v56_v21 = vand.u32 2147483647, %v54_v15  ;;  %v70_v22 = vsub.f32 %v36_v0, %v69_v10  ;;  %v71_v23 = vsub.f32 %v37_v1, %v69_v10  ;;  %s419_s23 = sld [smem:[#allocation2 + $0xe]]  ;;  %s428_s24 = sld [smem:[#allocation2 + $0x11]] }
  0x2a   :  { %v51_v24 = vmin.f32 %v43_v13, %v49_v16  ;;  %v57_v25 = vand.u32 2147483647, %v55_v17  ;;  %v64_v26 = vand.u32 2147483647, %v62_v18  ;;  %v65_v27 = vand.u32 2147483647, %v63_v19 }
  0x2b   :  { %v58_v28 = vmin.f32 %v50_v20, %v56_v21  ;;  %v72_v29 = vand.u32 2147483647, %v70_v22  ;;  %v73_v30 = vand.u32 2147483647, %v71_v23  ;;  %v78_v31 = vsub.f32 %v36_v0, %v77_v11  ;;  %s432_s25 = sld [smem:[#allocation2 + $0x14]]  ;;  %s435_s26 = sld [smem:[#allocation2 + $0x17]] }
  0x2c   :  { %v59_v32 = vmin.f32 %v51_v24, %v57_v25  ;;  %v79_v33 = vsub.f32 %v37_v1, %v77_v11  ;;  %v85_v34 = vstv %s353_s10  ;;  %v93_v35 = vstv %s355_s1  ;;  %v412_v24 = vld [vmem:[#allocation5 + $0x20] sm:$0xff]  ;;  %v414_v25 = vld [vmem:[#allocation5 + $0x28] sm:$0xff] }
  0x2d   :  { %v66_v36 = vmin.f32 %v58_v28, %v64_v26  ;;  %v80_v37 = vand.u32 2147483647, %v78_v31  ;;  %v86_v38 = vsub.f32 %v36_v0, %v85_v34  ;;  %v87_v39 = vsub.f32 %v37_v1, %v85_v34 }
  0x2e   :  { %v67_v41 = vmin.f32 %v59_v32, %v65_v27  ;;  %v81_v42 = vand.u32 2147483647, %v79_v33  ;;  %v374_v45 = vsub.f32 %v36_v0, %v93_v35  ;;  %v376_v46 = vsub.f32 %v37_v1, %v93_v35 }
  0x2f   :  { %v74_v44 = vmin.f32 %v66_v36, %v72_v29  ;;  %v104_v47 = vstv %s358_s11  ;;  %v88_v49 = vand.u32 2147483647, %v86_v38  ;;  %v89_v50 = vand.u32 2147483647, %v87_v39 }
  0x30   :  { %v75_v48 = vmin.f32 %v67_v41, %v73_v30  ;;  %v105_v51 = vsub.f32 %v368_v40, %v104_v47  ;;  %v106_v53 = vsub.f32 %v370_v43, %v104_v47  ;;  %v110_v54 = vstv %s360_s12 }
  0x31   :  { %v82_v52 = vmin.f32 %v74_v44, %v80_v37  ;;  %v118_v55 = vstv %s362_s13  ;;  %v111_v58 = vsub.f32 %v368_v40, %v110_v54  ;;  %v112_v59 = vsub.f32 %v370_v43, %v110_v54 }
  0x32   :  { %v83_v56 = vmin.f32 %v75_v48, %v81_v42  ;;  %v107_v57 = vand.u32 2147483647, %v105_v51  ;;  %v96_v60 = vand.u32 2147483647, %v374_v45  ;;  %v108_v61 = vand.u32 2147483647, %v106_v53 }
  0x33   :  { %v119_v62 = vsub.f32 %v368_v40, %v118_v55  ;;  %v120_v63 = vsub.f32 %v370_v43, %v118_v55  ;;  %v97_v0 = vand.u32 2147483647, %v376_v46  ;;  %v113_v1 = vand.u32 2147483647, %v111_v58 }
  0x34   :  { %v114_v2 = vand.u32 2147483647, %v112_v59  ;;  %v126_v3 = vstv %s366_s14  ;;  %v90_v4 = vmin.f32 %v82_v52, %v88_v49  ;;  %v91_v8 = vmin.f32 %v83_v56, %v89_v50 }
  0x35   :  { %v121_v5 = vand.u32 2147483647, %v119_v62  ;;  %v122_v6 = vand.u32 2147483647, %v120_v63  ;;  %v127_v7 = vsub.f32 %v368_v40, %v126_v3  ;;  %v115_v9 = vmin.f32 %v107_v57, %v113_v1 }
  0x36   :  { %v116_v10 = vmin.f32 %v108_v61, %v114_v2  ;;  %v128_v11 = vsub.f32 %v370_v43, %v126_v3  ;;  %v134_v13 = vstv %s372_s15  ;;  %v142_v14 = vstv %s379_s16 }
  0x37   :  { %v129_v12 = vand.u32 2147483647, %v127_v7  ;;  %v150_v15 = vstv %s381_s17  ;;  %v123_v16 = vmin.f32 %v115_v9, %v121_v5  ;;  %v135_v19 = vsub.f32 %v368_v40, %v134_v13 }
  0x38   :  { %v124_v17 = vmin.f32 %v116_v10, %v122_v6  ;;  %v130_v18 = vand.u32 2147483647, %v128_v11  ;;  %v136_v20 = vsub.f32 %v370_v43, %v134_v13  ;;  %v143_v21 = vsub.f32 %v368_v40, %v142_v14 }
  0x39   :  { %v144_v22 = vsub.f32 %v370_v43, %v142_v14  ;;  %v151_v23 = vsub.f32 %v368_v40, %v150_v15  ;;  %v131_v26 = vmin.f32 %v123_v16, %v129_v12  ;;  %v137_v28 = vand.u32 2147483647, %v135_v19 }
  0x3a   :  { %v132_v27 = vmin.f32 %v124_v17, %v130_v18  ;;  %v152_v29 = vsub.f32 %v370_v43, %v150_v15  ;;  %v138_v30 = vand.u32 2147483647, %v136_v20  ;;  %v145_v31 = vand.u32 2147483647, %v143_v21 }
  0x3b   :  { %v146_v32 = vand.u32 2147483647, %v144_v22  ;;  %v158_v33 = vstv %s389_s18  ;;  %v139_v34 = vmin.f32 %v131_v26, %v137_v28  ;;  %v153_v35 = vand.u32 2147483647, %v151_v23 }
  0x3c   :  { %v154_v36 = vand.u32 2147483647, %v152_v29  ;;  %v159_v37 = vsub.f32 %v368_v40, %v158_v33  ;;  %v140_v38 = vmin.f32 %v132_v27, %v138_v30  ;;  %v160_v39 = vsub.f32 %v370_v43, %v158_v33 }
  0x3d   :  { %v171_v41 = vstv %s394_s19  ;;  %v177_v42 = vstv %s399_s20  ;;  %v147_v44 = vmin.f32 %v139_v34, %v145_v31  ;;  %v185_v55 = vstv %s406_s21 }
  0x3e   :  { %v161_v47 = vand.u32 2147483647, %v159_v37  ;;  %v172_v48 = vsub.f32 %v412_v24, %v171_v41  ;;  %v173_v49 = vsub.f32 %v414_v25, %v171_v41  ;;  %v148_v50 = vmin.f32 %v140_v38, %v146_v32 }
  0x3f   :  { %v162_v51 = vand.u32 2147483647, %v160_v39  ;;  %v178_v40 = vsub.f32 %v412_v24, %v177_v42  ;;  %v179_v52 = vsub.f32 %v414_v25, %v177_v42  ;;  %v155_v43 = vmin.f32 %v147_v44, %v153_v35 }
  0x40   :  { %v174_v53 = vand.u32 2147483647, %v172_v48  ;;  %v175_v54 = vand.u32 2147483647, %v173_v49  ;;  %v156_v56 = vmin.f32 %v148_v50, %v154_v36  ;;  %v186_v59 = vsub.f32 %v412_v24, %v185_v55 }
  0x41   :  { %v180_v57 = vand.u32 2147483647, %v178_v40  ;;  %v181_v58 = vand.u32 2147483647, %v179_v52  ;;  %v98_v61 = vmin.f32 %v90_v4, %v96_v60  ;;  %v187_v62 = vsub.f32 %v414_v25, %v185_v55 }
  0x42   :  { %v193_v63 = vstv %s417_s22  ;;  %v201_v1 = vstv %s419_s23  ;;  %v99_v2 = vmin.f32 %v91_v8, %v97_v0  ;;  %v188_v6 = vand.u32 2147483647, %v186_v59 }
  0x43   :  { %v182_v3 = vmin.f32 %v174_v53, %v180_v57  ;;  %v183_v5 = vmin.f32 %v175_v54, %v181_v58  ;;  %v163_v7 = vmin.f32 %v155_v43, %v161_v47  ;;  %v189_v9 = vand.u32 2147483647, %v187_v62 }
  0x44   :  { %v194_v10 = vsub.f32 %v412_v24, %v193_v63  ;;  %v195_v11 = vsub.f32 %v414_v25, %v193_v63  ;;  %v164_v45 = vmin.f32 %v156_v56, %v162_v51  ;;  %v202_v4 = vsub.f32 %v412_v24, %v201_v1 }
  0x45   :  { %v190_v60 = vmin.f32 %v182_v3, %v188_v6  ;;  %v203_v12 = vsub.f32 %v414_v25, %v201_v1  ;;  %v191_v46 = vmin.f32 %v183_v5, %v189_v9  ;;  %v209_v8 = vstv %s428_s24 }
  0x46   :  { %v196_v13 = vand.u32 2147483647, %v194_v10  ;;  %v197_v0 = vand.u32 2147483647, %v195_v11  ;;  %v204_v14 = vand.u32 2147483647, %v202_v4  ;;  %v210_v16 = vsub.f32 %v412_v24, %v209_v8 }
  0x47   :  { %v205_v15 = vand.u32 2147483647, %v203_v12  ;;  %v211_v17 = vsub.f32 %v414_v25, %v209_v8  ;;  %v217_v20 = vstv %s432_s25  ;;  %v225_v21 = vstv %s435_s26 }
  0x48   :  { %v198_v18 = vmin.f32 %v190_v60, %v196_v13  ;;  %v199_v19 = vmin.f32 %v191_v46, %v197_v0  ;;  %v212_v22 = vand.u32 2147483647, %v210_v16  ;;  %v218_v26 = vsub.f32 %v412_v24, %v217_v20 }
  0x49   :  { %v213_v23 = vand.u32 2147483647, %v211_v17  ;;  %v219_v27 = vsub.f32 %v414_v25, %v217_v20  ;;  %v226_v30 = vsub.f32 %v412_v24, %v225_v21  ;;  %v227_v31 = vsub.f32 %v414_v25, %v225_v21 }
  0x4a   :  { %v206_v28 = vmin.f32 %v198_v18, %v204_v14  ;;  %v207_v29 = vmin.f32 %v199_v19, %v205_v15  ;;  %v220_v32 = vand.u32 2147483647, %v218_v26  ;;  %v165_v38 = vadd.f32 %v163_v7, %v98_v61 }
  0x4b   :  { %v221_v33 = vand.u32 2147483647, %v219_v27  ;;  %v228_v36 = vand.u32 2147483647, %v226_v30  ;;  %v229_v37 = vand.u32 2147483647, %v227_v31  ;;  %v166_v39 = vadd.f32 %v164_v45, %v99_v2 }
  0x4c   :  { %v214_v34 = vmin.f32 %v206_v28, %v212_v22  ;;  %v215_v35 = vmin.f32 %v207_v29, %v213_v23 }
  0x4e   :  { %v222_v41 = vmin.f32 %v214_v34, %v220_v32  ;;  %v223_v42 = vmin.f32 %v215_v35, %v221_v33 }
  0x50   :  { %v230_v44 = vmin.f32 %v222_v41, %v228_v36  ;;  %v231_v47 = vmin.f32 %v223_v42, %v229_v37 }
  0x52   :  { %v232_v48 = vadd.f32 %v230_v44, %v165_v38  ;;  %v233_v49 = vadd.f32 %v231_v47, %v166_v39 }
  0x54   :  { %v234_v50 = vadd.f32 %v233_v49, %v232_v48 }
  0x56   :  { %235 = vadd.xlane.f32.xlu0 %v234_v50 }
  0xe3   :  { %v236_v24 = vpop.xlane.xlu0 %235 }
  0xe4   :  { %238 = vst.msk [vmem:[%s463_s2] sm:$0xff] %vm237_vm0, %v236_v24 }
  0xe5   :  { %243 = vsyncpa [#allocation3], 1 }
  0xe6   :  { %244 = vsyncpa [#allocation4], 1 }

</bundles_post_ra>
